<compile_context>
chip_gen: v6e
topology: v6e:2x2x1
jax: 0.10.0
libtpu: 0.0.40
codegen_flags: <defaults>
</compile_context>

<pallas_src>
import functools
import math

import jax
import jax.numpy as jnp
from jax import lax
from jax.experimental import pallas as pl
from jax.experimental.pallas import tpu as pltpu


def _round_up(x, m):
    return ((x + m - 1) // m) * m


def _cdiv(a, b):
    return (a + b - 1) // b


# ----------------------------------------------------------------------------
# Kernels.  Grid = (Mp/tm, Np/tn, Kp/tk), K innermost ("arbitrary").
# ----------------------------------------------------------------------------
def _linear_add_kernel_f32out(x_ref, w_ref, b_ref, y_ref, o_ref):
    """f32 output: accumulate directly in the resident output block (no scratch)."""
    k = pl.program_id(2)

    @pl.when(k == 0)
    def _():
        o_ref[...] = (b_ref[...].astype(jnp.float32)
                      + y_ref[...].astype(jnp.float32))

    # x tile (tm, tk) x W tile (tn, tk): contract last dims of both
    # (torch [N, K] weight layout, no transpose pass anywhere).
    o_ref[...] += lax.dot_general(
        x_ref[...], w_ref[...],
        dimension_numbers=(((1,), (1,)), ((), ())),
        preferred_element_type=jnp.float32,
    )


def _linear_add_kernel_acc(x_ref, w_ref, b_ref, y_ref, o_ref, acc_ref):
    """Narrow output dtype: accumulate in f32 VMEM scratch, cast in the epilogue."""
    k = pl.program_id(2)

    @pl.when(k == 0)
    def _():
        acc_ref[...] = jnp.zeros_like(acc_ref)

    acc_ref[...] += lax.dot_general(
        x_ref[...], w_ref[...],
        dimension_numbers=(((1,), (1,)), ((), ())),
        preferred_element_type=jnp.float32,
    )

    @pl.when(k == pl.num_programs(2) - 1)
    def _():
        out = (acc_ref[...]
               + b_ref[...].astype(jnp.float32)
               + y_ref[...].astype(jnp.float32))
        o_ref[...] = out.astype(o_ref.dtype)


@functools.partial(jax.jit, static_argnames=("tm", "tn", "tk", "mxu_dtype"))
def ipex_linear_add(x, weight, bias, y, *, tm=512, tn=512, tk=512,
                    mxu_dtype=None):
    """out = x @ weight.T + bias + y

    x:      [..., K]
    weight: [N, K]   (torch nn.Linear layout, NOT transposed in the wrapper)
    bias:   [N]
    y:      [..., N] (residual, same leading dims as x)
    """
    batch_shape = x.shape[:-1]
    K = x.shape[-1]
    N = weight.shape[0]
    M = math.prod(batch_shape) if batch_shape else 1

    out_dtype = jnp.result_type(x.dtype, weight.dtype, bias.dtype, y.dtype)
    f32_out = out_dtype == jnp.float32

    # Clip tiles to the (padded) problem size, keep (8, 128) alignment.
    tm = _round_up(min(tm, _round_up(M, 8)), 8)
    tn = _round_up(min(tn, _round_up(N, 128)), 128)
    tk = _round_up(min(tk, _round_up(K, 128)), 128)

    # v7x has 2 TensorCores: for decode-like shapes where both M and N would
    # collapse to a single block, split the N tile so a "parallel" axis has
    # >= 2 blocks and both cores get work.
    if (_round_up(M, tm) // tm == 1 and _round_up(N, tn) // tn == 1
            and N >= 256):
        tn = max(128, _round_up(_cdiv(N, 2), 128))

    Mp = _round_up(M, tm)
    Np = _round_up(N, tn)
    Kp = _round_up(K, tk)

    x2 = x.reshape(M, K)
    w2 = weight                       # stays [N, K]
    b2 = bias.reshape(1, N)
    y2 = y.reshape(M, N)              # no astype: kernel upcasts in-register

    # Zero padding keeps the K reduction exact and every block full / lane
    # dense (unmasked vst on the output).
    # TODO(synk): for ragged N/K the weight pad is a per-call N*K HBM pass;
    # pre-pad (or pre-lay-out) the weight once at model-load time instead.
    if Mp != M or Kp != K:
        x2 = jnp.pad(x2, ((0, Mp - M), (0, Kp - K)))
    if Np != N or Kp != K:
        w2 = jnp.pad(w2, ((0, Np - N), (0, Kp - K)))
    if Np != N:
        b2 = jnp.pad(b2, ((0, 0), (0, Np - N)))
    if Mp != M or Np != N:
        y2 = jnp.pad(y2, ((0, Mp - M), (0, Np - N)))

    if mxu_dtype is not None:
        # Optional: halve HBM traffic of the two streaming matmul operands.
        x2 = x2.astype(mxu_dtype)
        w2 = w2.astype(mxu_dtype)

    grid = (Mp // tm, Np // tn, Kp // tk)

    in_specs = [
        pl.BlockSpec((tm, tk), lambda i, j, k: (i, k)),   # x
        pl.BlockSpec((tn, tk), lambda i, j, k: (j, k)),   # W  ([N, K])
        pl.BlockSpec((1, tn), lambda i, j, k: (0, j)),    # bias  (k-invariant)
        pl.BlockSpec((tm, tn), lambda i, j, k: (i, j)),   # y     (k-invariant)
    ]
    out_spec = pl.BlockSpec((tm, tn), lambda i, j, k: (i, j))

    if f32_out:
        kernel = _linear_add_kernel_f32out
        scratch_shapes = []
    else:
        kernel = _linear_add_kernel_acc
        scratch_shapes = [pltpu.VMEM((tm, tn), jnp.float32)]

    # VMEM budget: double-buffered in/out blocks (+ scratch) with generous
    # headroom, capped at 48 MiB so it also fits v7x's 64 MiB per-TC VMEM.
    def _bpe(a):
        return jnp.dtype(a.dtype).itemsize

    o_bpe = jnp.dtype(out_dtype).itemsize
    vmem_est = 2 * (tm * tk * _bpe(x2) + tn * tk * _bpe(w2)
                    + 8 * tn * _bpe(b2) + tm * tn * _bpe(y2)
                    + tm * tn * o_bpe)
    if not f32_out:
        vmem_est += tm * tn * 4
    vmem_limit = int(min(48 * 1024 * 1024, 2 * vmem_est + 8 * 1024 * 1024))

    cost = pl.CostEstimate(
        flops=2 * M * N * K,
        bytes_accessed=(M * K * _bpe(x2) + N * K * _bpe(w2) + N * _bpe(b2)
                        + M * N * _bpe(y2) + M * N * o_bpe),
        transcendentals=0,
    )

    out2 = pl.pallas_call(
        kernel,
        out_shape=jax.ShapeDtypeStruct((Mp, Np), out_dtype),
        grid_spec=pltpu.PrefetchScalarGridSpec(
            num_scalar_prefetch=0,
            grid=grid,
            in_specs=in_specs,
            out_specs=out_spec,
            scratch_shapes=scratch_shapes,
        ),
        compiler_params=pltpu.CompilerParams(
            dimension_semantics=("parallel", "parallel", "arbitrary"),
            vmem_limit_bytes=vmem_limit,
        ),
        cost_estimate=cost,
    )(x2, w2, b2, y2)

    out2 = out2[:M, :N]
    return out2.reshape(*batch_shape, N)


def _reference(x, weight, bias, y):
    return (jnp.einsum("...k,nk->...n", x.astype(jnp.float32),
                       weight.astype(jnp.float32))
            + bias.astype(jnp.float32) + y.astype(jnp.float32))


def _make_inputs(key, batch, seq, in_features, out_features, dtype):
    k1, k2, k3, k4, key = jax.random.split(key, 5)
    bound = 1.0 / (in_features ** 0.5)
    x = jax.random.normal(k1, (batch, seq, in_features), dtype=jnp.float32)
    w = jax.random.uniform(k2, (out_features, in_features),
                           minval=-bound, maxval=bound, dtype=jnp.float32)
    b = jax.random.uniform(k3, (out_features,),
                           minval=-bound, maxval=bound, dtype=jnp.float32)
    y = jax.random.normal(k4, (batch, seq, out_features), dtype=jnp.float32)
    return (x.astype(dtype), w.astype(dtype), b.astype(dtype),
            y.astype(dtype), key)


if __name__ == "__main__":
    key = jax.random.PRNGKey(0)

    # --- Test 1: small transformer-like shapes (single-block grid) ---------
    x, w, b, y, key = _make_inputs(key, 2, 8, 32, 32, jnp.float32)
    out = jax.block_until_ready(ipex_linear_add(x, w, b, y))
    ref = _reference(x, w, b, y)
    assert out.shape == ref.shape
    assert jnp.allclose(out, ref, atol=1e-4, rtol=1e-4), "test1 mismatch"

    # --- Test 2: ragged (non-128-aligned) dims exercise the padding path ---
    x, w, b, y, key = _make_inputs(key, 3, 10, 200, 200, jnp.float32)
    out = jax.block_until_ready(ipex_linear_add(x, w, b, y))
    ref = _reference(x, w, b, y)
    assert jnp.allclose(out, ref, atol=1e-3, rtol=1e-3), "test2 mismatch"

    # --- Test 3: explicit small tiles exercise a multi-block (2,2,2) grid --
    x, w, b, y, key = _make_inputs(key, 2, 16, 256, 256, jnp.float32)
    out = jax.block_until_ready(
        ipex_linear_add(x, w, b, y, tm=16, tn=128, tk=128))
    ref = _reference(x, w, b, y)
    assert jnp.allclose(out, ref, atol=1e-3, rtol=1e-3), "test3 mismatch"

    # --- Test 4: bf16 inputs/output exercise the f32-scratch epilogue path -
    x, w, b, y, key = _make_inputs(key, 2, 16, 256, 256, jnp.bfloat16)
    out = jax.block_until_ready(
        ipex_linear_add(x, w, b, y, tm=16, tn=128, tk=128))
    ref = _reference(x, w, b, y)
    assert out.dtype == jnp.bfloat16
    assert jnp.allclose(out.astype(jnp.float32), ref,
                        atol=3e-2, rtol=3e-2), "test4 mismatch"

    # --- Test 5: decode-like shape (M=1) exercises the N-split heuristic ---
    x, w, b, y, key = _make_inputs(key, 1, 1, 512, 512, jnp.float32)
    out = jax.block_until_ready(ipex_linear_add(x, w, b, y))
    ref = _reference(x, w, b, y)
    assert jnp.allclose(out, ref, atol=2e-3, rtol=2e-3), "test5 mismatch"

    print("KERNEL_OK")
</pallas_src>

<mosaic_0001>
module attributes {stable_mosaic.version = 11 : i64} {
  func.func @_linear_add_kernel_f32out(%arg0: i32, %arg1: i32, %arg2: i32, %arg3: memref<16x128xf32, #tpu.memory_space<vmem>>, %arg4: memref<128x128xf32, #tpu.memory_space<vmem>>, %arg5: memref<1x128xf32, #tpu.memory_space<vmem>>, %arg6: memref<16x128xf32, #tpu.memory_space<vmem>>, %arg7: memref<16x128xf32, #tpu.memory_space<vmem>>) attributes {dimension_semantics = [#tpu.dimension_semantics<parallel>, #tpu.dimension_semantics<parallel>, #tpu.dimension_semantics<arbitrary>], iteration_bounds = array<i64: 1, 1, 1>, scalar_prefetch = 0 : i64, scratch_operands = 0 : i64, tpu.core_type = #tpu.core_type<tc>, window_params = [{transform_indices = @transform_0, window_bounds = array<i64: 16, 128>}, {transform_indices = @transform_1, window_bounds = array<i64: 128, 128>}, {transform_indices = @transform_2, window_bounds = array<i64: 1, 128>}, {transform_indices = @transform_3, window_bounds = array<i64: 16, 128>}, {transform_indices = @transform_4, window_bounds = array<i64: 16, 128>}]} {
    %c0_i32 = arith.constant 0 : i32
    %0 = arith.cmpi eq, %arg2, %c0_i32 : i32
    %1 = arith.extui %0 : i1 to i32
    %c0_i32_0 = arith.constant 0 : i32
    %2 = arith.cmpi ne, %1, %c0_i32_0 : i32
    scf.if %2 {
      %c0_8 = arith.constant 0 : index
      %c0_9 = arith.constant 0 : index
      %9 = vector.load %arg5[%c0_8, %c0_9] : memref<1x128xf32, #tpu.memory_space<vmem>>, vector<1x128xf32>
      %c0_10 = arith.constant 0 : index
      %c0_11 = arith.constant 0 : index
      %10 = vector.load %arg6[%c0_10, %c0_11] : memref<16x128xf32, #tpu.memory_space<vmem>>, vector<16x128xf32>
      %11 = vector.broadcast %9 : vector<1x128xf32> to vector<16x128xf32>
      %12 = arith.addf %11, %10 : vector<16x128xf32>
      %c0_12 = arith.constant 0 : index
      %c0_13 = arith.constant 0 : index
      %13 = vector.load %arg7[%c0_12, %c0_13] : memref<16x128xf32, #tpu.memory_space<vmem>>, vector<16x128xf32>
      tpu.vector_store %arg7[%c0_12, %c0_13], %12 {strides = array<i32>} : memref<16x128xf32, #tpu.memory_space<vmem>>, vector<16x128xf32>,
    } else {
    }
    %c0 = arith.constant 0 : index
    %c0_1 = arith.constant 0 : index
    %3 = vector.load %arg7[%c0, %c0_1] : memref<16x128xf32, #tpu.memory_space<vmem>>, vector<16x128xf32>
    %c0_2 = arith.constant 0 : index
    %c0_3 = arith.constant 0 : index
    %4 = vector.load %arg3[%c0_2, %c0_3] : memref<16x128xf32, #tpu.memory_space<vmem>>, vector<16x128xf32>
    %c0_4 = arith.constant 0 : index
    %c0_5 = arith.constant 0 : index
    %5 = vector.load %arg4[%c0_4, %c0_5] : memref<128x128xf32, #tpu.memory_space<vmem>>, vector<128x128xf32>
    %cst = arith.constant dense<0.000000e+00> : vector<16x128xf32>
    %6 = tpu.matmul %4, %5, %cst {dimension_numbers = #tpu.dot_dimension_numbers<[1], [1], [0], [0], [0, 0, 1, 0], [], []>} : vector<16x128xf32>, vector<128x128xf32>, vector<16x128xf32> -> vector<16x128xf32>
    %7 = arith.addf %3, %6 : vector<16x128xf32>
    %c0_6 = arith.constant 0 : index
    %c0_7 = arith.constant 0 : index
    %8 = vector.load %arg7[%c0_6, %c0_7] : memref<16x128xf32, #tpu.memory_space<vmem>>, vector<16x128xf32>
    tpu.vector_store %arg7[%c0_6, %c0_7], %7 {strides = array<i32>} : memref<16x128xf32, #tpu.memory_space<vmem>>, vector<16x128xf32>,
    return
  }
  func.func @transform_0(%arg0: i32, %arg1: i32, %arg2: i32) -> (i32, i32) {
    %c0_i32 = arith.constant 0 : i32
    return %arg0, %arg2 : i32, i32
  }
  func.func @transform_1(%arg0: i32, %arg1: i32, %arg2: i32) -> (i32, i32) {
    %c0_i32 = arith.constant 0 : i32
    return %arg1, %arg2 : i32, i32
  }
  func.func @transform_2(%arg0: i32, %arg1: i32, %arg2: i32) -> (i32, i32) {
    %c0_i32 = arith.constant 0 : i32
    %c0_i32_0 = arith.constant 0 : i32
    return %c0_i32, %arg1 : i32, i32
  }
  func.func @transform_3(%arg0: i32, %arg1: i32, %arg2: i32) -> (i32, i32) {
    %c0_i32 = arith.constant 0 : i32
    return %arg0, %arg1 : i32, i32
  }
  func.func @transform_4(%arg0: i32, %arg1: i32, %arg2: i32) -> (i32, i32) {
    %c0_i32 = arith.constant 0 : i32
    return %arg0, %arg1 : i32, i32
  }
}

</mosaic_0001>

<bundles_post_ra>
// kernel: ipex_linear_add.1
= control target key start
LH: loop header
LB: loop body
LE: loop exit
PB: predicated region body
PF: predicated region fallthrough
CT: control target
= control target key end

     0   :  { %s285_s1 = inlined_call_operand.vmem [shape: f32[128,128], index: 1, kind: input, shape index: {}]   ;;  %s286_s0 = inlined_call_operand.vmem [shape: f32[16,128], index: 0, kind: input, shape index: {}]   ;;  %s287_s2 = inlined_call_operand.vmem [shape: f32[1,128], index: 2, kind: input, shape index: {}]   ;;  %s288_s3 = inlined_call_operand.vmem [shape: f32[16,128], index: 3, kind: input, shape index: {}]   ;;  %s289_s4 = inlined_call_operand.vmem [shape: f32[16,128], index: 4, kind: output, shape index: {}]  }
   0x1   :  { %v53_v0 = vld [vmem:[%s285_s1 + $0x78] sm:$0xff]  ;;  %v52_v1 = vld [vmem:[%s285_s1 + $0x70] sm:$0xff]  ;;  %v51_v2 = vld [vmem:[%s285_s1 + $0x68] sm:$0xff] }
   0x2   :  { %156 = vmatprep.subr.mxu0 %v53_v0  ;;  %v36_v3 = vld [vmem:[%s286_s0] sm:$0xff]  ;;  %v49_v5 = vld [vmem:[%s285_s1 + $0x58] sm:$0xff]  ;;  %v48_v6 = vld [vmem:[%s285_s1 + $0x50] sm:$0xff] }
   0x3   :  { %157 = vmatpush3.xpose.msra.mxu0 %v53_v0  ;;  %188 = vmatprep.mubr.f32.mxu0 %v36_v3  ;;  %v50_v4 = vld [vmem:[%s285_s1 + $0x60] sm:$0xff]  ;;  %v47_v7 = vld [vmem:[%s285_s1 + $0x48] sm:$0xff]  ;;  %v45_v9 = vld [vmem:[%s285_s1 + $0x38] sm:$0xff] }
   0x4   :  { %158 = vmatprep.subr.mxu0 %v52_v1  ;;  %v46_v8 = vld [vmem:[%s285_s1 + $0x40] sm:$0xff]  ;;  %v44_v10 = vld [vmem:[%s285_s1 + $0x30] sm:$0xff]  ;;  %v43_v11 = vld [vmem:[%s285_s1 + $0x28] sm:$0xff] }
   0x5   :  { %v42_v12 = vld [vmem:[%s285_s1 + $0x20] sm:$0xff]  ;;  %v41_v13 = vld [vmem:[%s285_s1 + $0x18] sm:$0xff]  ;;  %v40_v14 = vld [vmem:[%s285_s1 + $0x10] sm:$0xff] }
   0x6   :  { %v39_v15 = vld [vmem:[%s285_s1 + $0x8] sm:$0xff]  ;;  %v38_v16 = vld [vmem:[%s285_s1] sm:$0xff] }
   0x7   :  { %159 = vmatpush3.xpose.msra.mxu0 %v52_v1  ;;  %v37_v17 = vld [vmem:[%s286_s0 + $0x8] sm:$0xff]  ;;  %v137_v18 = vld [vmem:[%s287_s2] ss:$0 sm:$0xff] }
   0x8   :  { %160 = vmatprep.subr.mxu0 %v51_v2  ;;  %v23_v19 = vld [vmem:[%s288_s3 + $0x8] sm:$0xff]  ;;  %v22_v20 = vld [vmem:[%s288_s3] sm:$0xff] }
   0x9   :  { %v31_v21 = vadd.f32 %v137_v18, %v23_v19  ;;  %v30_v22 = vadd.f32 %v137_v18, %v22_v20 }
   0xb   :  { %161 = vmatpush3.xpose.msra.mxu0 %v51_v2 }
   0xc   :  { %162 = vmatprep.subr.mxu0 %v50_v4 }
   0xf   :  { %163 = vmatpush3.xpose.msra.mxu0 %v50_v4 }
  0x10   :  { %164 = vmatprep.subr.mxu0 %v49_v5 }
  0x13   :  { %165 = vmatpush3.xpose.msra.mxu0 %v49_v5 }
  0x14   :  { %166 = vmatprep.subr.mxu0 %v48_v6 }
  0x17   :  { %167 = vmatpush3.xpose.msra.mxu0 %v48_v6 }
  0x18   :  { %168 = vmatprep.subr.mxu0 %v47_v7 }
  0x1b   :  { %169 = vmatpush3.xpose.msra.mxu0 %v47_v7 }
  0x1c   :  { %170 = vmatprep.subr.mxu0 %v46_v8 }
  0x1f   :  { %171 = vmatpush3.xpose.msra.mxu0 %v46_v8 }
  0x20   :  { %172 = vmatprep.subr.mxu0 %v45_v9 }
  0x23   :  { %173 = vmatpush3.xpose.msra.mxu0 %v45_v9 }
  0x24   :  { %174 = vmatprep.subr.mxu0 %v44_v10 }
  0x27   :  { %175 = vmatpush3.xpose.msra.mxu0 %v44_v10 }
  0x28   :  { %176 = vmatprep.subr.mxu0 %v43_v11 }
  0x2b   :  { %177 = vmatpush3.xpose.msra.mxu0 %v43_v11 }
  0x2c   :  { %178 = vmatprep.subr.mxu0 %v42_v12 }
  0x2f   :  { %179 = vmatpush3.xpose.msra.mxu0 %v42_v12 }
  0x30   :  { %180 = vmatprep.subr.mxu0 %v41_v13 }
  0x33   :  { %181 = vmatpush3.xpose.msra.mxu0 %v41_v13 }
  0x34   :  { %182 = vmatprep.subr.mxu0 %v40_v14 }
  0x37   :  { %183 = vmatpush3.xpose.msra.mxu0 %v40_v14 }
  0x38   :  { %184 = vmatprep.subr.mxu0 %v39_v15 }
  0x3b   :  { %185 = vmatpush3.xpose.msra.mxu0 %v39_v15 }
  0x3c   :  { %186 = vmatprep.subr.mxu0 %v38_v16 }
  0x3f   :  { %187 = vmatpush3.xpose.msra.mxu0 %v38_v16 }
  0x42   :  { %189 = vmatmul.mubr.f32.vlgmr.msra.gmra.mxu0 %v37_v17 }
 0x102   :  { %v190_v23 = vpop.f32.mrf.mxu0 }
 0x103   :  { %v130_v24 = vadd.f32 %v190_v23, %v31_v21 }
 0x104   :  { %v120_v25 = vpop.f32.mrf.mxu0 }
 0x105   :  { %132 = vst [vmem:[%s289_s4 + $0x8] sm:$0xff] %v130_v24  ;;  %v129_v26 = vadd.f32 %v120_v25, %v30_v22 }
 0x107   :  { %131 = vst [vmem:[%s289_s4] sm:$0xff] %v129_v26 }

</bundles_post_ra>
